<compile_context>
chip_gen: v7x
topology: tpu7x:2x2x1
jax: 0.10.0
libtpu: 0.0.40
codegen_flags: <defaults>
</compile_context>

<pallas_src>
import jax
import jax.numpy as jnp
from jax.experimental import pallas as pl
from jax.experimental.pallas import tpu as pltpu


def _round_up(n, m):
    return ((n + m - 1) // m) * m


def _pad2d(x, rows, cols, dtype):
    x = x.astype(dtype)
    return jnp.pad(x, ((0, rows - x.shape[0]), (0, cols - x.shape[1])))


def _pick_tile(n_pad, max_tile):
    """Largest multiple of 128 that divides n_pad and is <= max_tile."""
    t = max(128, (min(max_tile, n_pad) // 128) * 128)
    while n_pad % t:
        t -= 128
    return t


# ---------------------------------------------------------------------------
# Kernel 1 (fused): Z = relu((A @ XW1) + b1) @ W2
# grid = (dst tiles, src/K tiles); agg_ref accumulates A_tile @ XW1_k over K.
# ---------------------------------------------------------------------------
def _fused_layer1_kernel(a_ref, xw1_ref, b1_ref, w2_ref, z_ref, agg_ref):
    k = pl.program_id(1)

    @pl.when(k == 0)
    def _init():
        agg_ref[...] = jnp.zeros_like(agg_ref)

    agg_ref[...] += jnp.dot(a_ref[...], xw1_ref[...],
                            preferred_element_type=jnp.float32)

    @pl.when(k == pl.num_programs(1) - 1)
    def _finalize():
        h = jnp.maximum(agg_ref[...] + b1_ref[...], 0.0)
        z = jnp.dot(h.astype(jnp.bfloat16), w2_ref[...],
                    preferred_element_type=jnp.float32)
        z_ref[...] = z.astype(z_ref.dtype)


# ---------------------------------------------------------------------------
# Kernel 2: out = A @ Z + b2
# The f32 output block is K-resident (index_map (i, 0)), so it doubles as the
# accumulator: init with broadcast b2 at k==0, accumulate directly.
# ---------------------------------------------------------------------------
def _aggregate_bias_kernel(a_ref, z_ref, b_ref, o_ref):
    k = pl.program_id(1)

    @pl.when(k == 0)
    def _init():
        o_ref[...] = jnp.zeros_like(o_ref) + b_ref[...]

    o_ref[...] += jnp.dot(a_ref[...], z_ref[...],
                          preferred_element_type=jnp.float32)


def gcn_forward(adj, x, params, *, tile_dst=512, tile_k=1024):
    """Full GCN forward (conv1 -> relu -> conv2) on a dense weighted adjacency."""
    n = adj.shape[0]
    h_feats = params["w1"].shape[1]
    n_cls = params["w2"].shape[1]

    n_pad = _round_up(n, 128)
    h_pad = _round_up(h_feats, 128)
    c_pad = _round_up(n_cls, 128)

    # Asymmetric tiles, clamped to divisors of n_pad (tiny graphs -> 128).
    tile_dst = _pick_tile(n_pad, tile_dst)
    tile_k = _pick_tile(n_pad, tile_k)

    # Precompute XW1 = X @ W1 in f32 outside Pallas (cheap, more accurate),
    # then feed the MXU in bf16.  Zero padding is exact under sum-aggregation.
    xw1 = jnp.dot(x.astype(jnp.float32), params["w1"].astype(jnp.float32))

    a_p = _pad2d(adj, n_pad, n_pad, jnp.bfloat16)
    xw1_p = _pad2d(xw1, n_pad, h_pad, jnp.bfloat16)
    w2_p = _pad2d(params["w2"], h_pad, c_pad, jnp.bfloat16)
    b1_p = _pad2d(params["b1"].reshape(1, -1), 1, h_pad, jnp.float32)
    b2_p = _pad2d(params["b2"].reshape(1, -1), 1, c_pad, jnp.float32)

    grid = (n_pad // tile_dst, n_pad // tile_k)   # (dst tiles, src/K tiles)
    dims = ("parallel", "arbitrary")              # dst axis shards across TCs
    cparams = pltpu.CompilerParams(
        dimension_semantics=dims,
        vmem_limit_bytes=32 * 1024 * 1024,
    )

    # --- fused layer 1 (+ W2 transform):  Z = relu(A @ XW1 + b1) @ W2 -------
    z = pl.pallas_call(
        _fused_layer1_kernel,
        out_shape=jax.ShapeDtypeStruct((n_pad, c_pad), jnp.bfloat16),
        grid_spec=pltpu.PrefetchScalarGridSpec(
            num_scalar_prefetch=0,
            grid=grid,
            in_specs=[
                pl.BlockSpec((tile_dst, tile_k), lambda i, k: (i, k)),   # A
                pl.BlockSpec((tile_k, h_pad), lambda i, k: (k, 0)),      # XW1
                pl.BlockSpec((1, h_pad), lambda i, k: (0, 0)),           # b1
                pl.BlockSpec((h_pad, c_pad), lambda i, k: (0, 0)),       # W2
            ],
            out_specs=pl.BlockSpec((tile_dst, c_pad), lambda i, k: (i, 0)),
            scratch_shapes=[pltpu.VMEM((tile_dst, h_pad), jnp.float32)],
        ),
        compiler_params=cparams,
    )(a_p, xw1_p, b1_p, w2_p)

    # --- layer 2 aggregation:  out = A @ Z + b2 ------------------------------
    out = pl.pallas_call(
        _aggregate_bias_kernel,
        out_shape=jax.ShapeDtypeStruct((n_pad, c_pad), jnp.float32),
        grid_spec=pltpu.PrefetchScalarGridSpec(
            num_scalar_prefetch=0,
            grid=grid,
            in_specs=[
                pl.BlockSpec((tile_dst, tile_k), lambda i, k: (i, k)),   # A
                pl.BlockSpec((tile_k, c_pad), lambda i, k: (k, 0)),      # Z
                pl.BlockSpec((1, c_pad), lambda i, k: (0, 0)),           # b2
            ],
            out_specs=pl.BlockSpec((tile_dst, c_pad), lambda i, k: (i, 0)),
        ),
        compiler_params=cparams,
    )(a_p, z, b2_p)

    return out[:n, :n_cls]


def gcn_reference_f32(adj, x, params):
    """Straight f32 reference (original module semantics)."""
    h = adj @ x @ params["w1"] + params["b1"]
    h = jnp.maximum(h, 0.0)
    return adj @ h @ params["w2"] + params["b2"]


def gcn_reference_bf16(adj, x, params):
    """Mirror of the kernel math (bf16 MXU operands, f32 accumulation)."""
    a = adj.astype(jnp.bfloat16)
    xw1 = jnp.dot(x.astype(jnp.float32),
                  params["w1"].astype(jnp.float32)).astype(jnp.bfloat16)
    agg = jnp.dot(a, xw1, preferred_element_type=jnp.float32)
    h = jnp.maximum(agg + params["b1"], 0.0)
    z = jnp.dot(h.astype(jnp.bfloat16), params["w2"].astype(jnp.bfloat16),
                preferred_element_type=jnp.float32).astype(jnp.bfloat16)
    return jnp.dot(a, z, preferred_element_type=jnp.float32) + params["b2"]


if __name__ == "__main__":
    # Small synthetic problem: 16 nodes, in_feats=8, h_feats=32, num_classes=4.
    # TODO(synk): DGL's sparse CSR message passing is represented here as a
    # dense weighted adjacency matrix (same math for norm='none' + edge weights).
    N, IN_FEATS, H_FEATS, NUM_CLASSES = 16, 8, 32, 4

    key = jax.random.PRNGKey(0)
    k_adj, k_w, k_x, k_w1, k_b1, k_w2, k_b2 = jax.random.split(key, 7)

    # Deterministic random sparse weighted graph as a dense adjacency matrix.
    mask = (jax.random.uniform(k_adj, (N, N)) < 0.3).astype(jnp.float32)
    edge_w = jax.random.uniform(k_w, (N, N), minval=0.1, maxval=1.0)
    adj = mask * edge_w  # adj[dst, src] = edge weight (g.edata['weight'])

    x = jax.random.normal(k_x, (N, IN_FEATS), dtype=jnp.float32)

    # Deterministic parameter init (glorot-ish scale), matching GraphConv shapes.
    params = {
        "w1": jax.random.normal(k_w1, (IN_FEATS, H_FEATS), jnp.float32)
        * (1.0 / jnp.sqrt(IN_FEATS)),
        "b1": jax.random.normal(k_b1, (H_FEATS,), jnp.float32) * 0.01,
        "w2": jax.random.normal(k_w2, (H_FEATS, NUM_CLASSES), jnp.float32)
        * (1.0 / jnp.sqrt(H_FEATS)),
        "b2": jax.random.normal(k_b2, (NUM_CLASSES,), jnp.float32) * 0.01,
    }

    out = jax.block_until_ready(gcn_forward(adj, x, params))
    assert out.shape == (N, NUM_CLASSES)

    # Tight check against a reference that mirrors the kernel's bf16/f32 math.
    ref_mirror = gcn_reference_bf16(adj, x, params)
    assert jnp.allclose(out, ref_mirror, atol=1e-2, rtol=1e-2)

    # Loose semantic check against the pure-f32 original-module math
    # (bf16 MXU operands introduce ~1% relative error).
    ref_f32 = gcn_reference_f32(adj, x, params)
    assert jnp.allclose(out, ref_f32, atol=3e-1, rtol=3e-1)

    print("KERNEL_OK")
</pallas_src>

<mosaic_0001>
module attributes {stable_mosaic.version = 11 : i64} {
  func.func @_fused_layer1_kernel(%arg0: i32, %arg1: i32, %arg2: memref<128x128xbf16, #tpu.memory_space<vmem>>, %arg3: memref<128x128xbf16, #tpu.memory_space<vmem>>, %arg4: memref<1x128xf32, #tpu.memory_space<vmem>>, %arg5: memref<128x128xbf16, #tpu.memory_space<vmem>>, %arg6: memref<128x128xbf16, #tpu.memory_space<vmem>>, %arg7: memref<128x128xf32, #tpu.memory_space<vmem>>) attributes {dimension_semantics = [#tpu.dimension_semantics<parallel>, #tpu.dimension_semantics<arbitrary>], iteration_bounds = array<i64: 1, 1>, scalar_prefetch = 0 : i64, scratch_operands = 1 : i64, tpu.core_type = #tpu.core_type<tc>, window_params = [{transform_indices = @transform_0, window_bounds = array<i64: 128, 128>}, {transform_indices = @transform_1, window_bounds = array<i64: 128, 128>}, {pipeline_mode = #tpu.pipeline_mode<synchronous>, transform_indices = @transform_2, window_bounds = array<i64: 1, 128>}, {pipeline_mode = #tpu.pipeline_mode<synchronous>, transform_indices = @transform_3, window_bounds = array<i64: 128, 128>}, {transform_indices = @transform_4, window_bounds = array<i64: 128, 128>}]} {
    %c0_i32 = arith.constant 0 : i32
    %0 = arith.cmpi eq, %arg1, %c0_i32 : i32
    %1 = arith.extui %0 : i1 to i32
    %c0_i32_0 = arith.constant 0 : i32
    %2 = arith.cmpi ne, %1, %c0_i32_0 : i32
    scf.if %2 {
      %cst_10 = arith.constant 0.000000e+00 : f32
      %12 = vector.broadcast %cst_10 : f32 to vector<128x128xf32>
      %c0_11 = arith.constant 0 : index
      %c0_12 = arith.constant 0 : index
      %13 = vector.load %arg7[%c0_11, %c0_12] : memref<128x128xf32, #tpu.memory_space<vmem>>, vector<128x128xf32>
      tpu.vector_store %arg7[%c0_11, %c0_12], %12 {strides = array<i32>} : memref<128x128xf32, #tpu.memory_space<vmem>>, vector<128x128xf32>,
    } else {
    }
    %c0 = arith.constant 0 : index
    %c0_1 = arith.constant 0 : index
    %3 = vector.load %arg7[%c0, %c0_1] : memref<128x128xf32, #tpu.memory_space<vmem>>, vector<128x128xf32>
    %c0_2 = arith.constant 0 : index
    %c0_3 = arith.constant 0 : index
    %4 = vector.load %arg2[%c0_2, %c0_3] : memref<128x128xbf16, #tpu.memory_space<vmem>>, vector<128x128xbf16>
    %c0_4 = arith.constant 0 : index
    %c0_5 = arith.constant 0 : index
    %5 = vector.load %arg3[%c0_4, %c0_5] : memref<128x128xbf16, #tpu.memory_space<vmem>>, vector<128x128xbf16>
    %cst = arith.constant dense<0.000000e+00> : vector<128x128xf32>
    %6 = tpu.matmul %4, %5, %cst {dimension_numbers = #tpu.dot_dimension_numbers<[1], [0], [0], [1], [0, 0, 1, 1], [], []>} : vector<128x128xbf16>, vector<128x128xbf16>, vector<128x128xf32> -> vector<128x128xf32>
    %7 = arith.addf %3, %6 : vector<128x128xf32>
    %c0_6 = arith.constant 0 : index
    %c0_7 = arith.constant 0 : index
    %8 = vector.load %arg7[%c0_6, %c0_7] : memref<128x128xf32, #tpu.memory_space<vmem>>, vector<128x128xf32>
    tpu.vector_store %arg7[%c0_6, %c0_7], %7 {strides = array<i32>} : memref<128x128xf32, #tpu.memory_space<vmem>>, vector<128x128xf32>,
    %c0_i32_8 = arith.constant 0 : i32
    %9 = arith.cmpi eq, %arg1, %c0_i32_8 : i32
    %10 = arith.extui %9 : i1 to i32
    %c0_i32_9 = arith.constant 0 : i32
    %11 = arith.cmpi ne, %10, %c0_i32_9 : i32
    scf.if %11 {
      %c0_10 = arith.constant 0 : index
      %c0_11 = arith.constant 0 : index
      %12 = vector.load %arg7[%c0_10, %c0_11] : memref<128x128xf32, #tpu.memory_space<vmem>>, vector<128x128xf32>
      %c0_12 = arith.constant 0 : index
      %c0_13 = arith.constant 0 : index
      %13 = vector.load %arg4[%c0_12, %c0_13] : memref<1x128xf32, #tpu.memory_space<vmem>>, vector<1x128xf32>
      %14 = vector.broadcast %13 : vector<1x128xf32> to vector<128x128xf32>
      %15 = arith.addf %12, %14 : vector<128x128xf32>
      %cst_14 = arith.constant 0.000000e+00 : f32
      %16 = vector.broadcast %cst_14 : f32 to vector<128x128xf32>
      %17 = arith.maximumf %15, %16 : vector<128x128xf32>
      %18 = arith.truncf %17 : vector<128x128xf32> to vector<128x128xbf16>
      %c0_15 = arith.constant 0 : index
      %c0_16 = arith.constant 0 : index
      %19 = vector.load %arg5[%c0_15, %c0_16] : memref<128x128xbf16, #tpu.memory_space<vmem>>, vector<128x128xbf16>
      %cst_17 = arith.constant dense<0.000000e+00> : vector<128x128xf32>
      %20 = tpu.matmul %18, %19, %cst_17 {dimension_numbers = #tpu.dot_dimension_numbers<[1], [0], [0], [1], [0, 0, 1, 1], [], []>} : vector<128x128xbf16>, vector<128x128xbf16>, vector<128x128xf32> -> vector<128x128xf32>
      %21 = arith.truncf %20 : vector<128x128xf32> to vector<128x128xbf16>
      %c0_18 = arith.constant 0 : index
      %c0_19 = arith.constant 0 : index
      %22 = vector.load %arg6[%c0_18, %c0_19] : memref<128x128xbf16, #tpu.memory_space<vmem>>, vector<128x128xbf16>
      tpu.vector_store %arg6[%c0_18, %c0_19], %21 {strides = array<i32>} : memref<128x128xbf16, #tpu.memory_space<vmem>>, vector<128x128xbf16>,
    } else {
    }
    return
  }
  func.func @transform_0(%arg0: i32, %arg1: i32) -> (i32, i32) {
    %c0_i32 = arith.constant 0 : i32
    return %arg0, %arg1 : i32, i32
  }
  func.func @transform_1(%arg0: i32, %arg1: i32) -> (i32, i32) {
    %c0_i32 = arith.constant 0 : i32
    %c0_i32_0 = arith.constant 0 : i32
    return %arg1, %c0_i32 : i32, i32
  }
  func.func @transform_2(%arg0: i32, %arg1: i32) -> (i32, i32) {
    %c0_i32 = arith.constant 0 : i32
    %c0_i32_0 = arith.constant 0 : i32
    %c0_i32_1 = arith.constant 0 : i32
    return %c0_i32, %c0_i32_0 : i32, i32
  }
  func.func @transform_3(%arg0: i32, %arg1: i32) -> (i32, i32) {
    %c0_i32 = arith.constant 0 : i32
    %c0_i32_0 = arith.constant 0 : i32
    %c0_i32_1 = arith.constant 0 : i32
    return %c0_i32, %c0_i32_0 : i32, i32
  }
  func.func @transform_4(%arg0: i32, %arg1: i32) -> (i32, i32) {
    %c0_i32 = arith.constant 0 : i32
    %c0_i32_0 = arith.constant 0 : i32
    return %arg0, %c0_i32 : i32, i32
  }
}

</mosaic_0001>

<bundles_post_ra>
// kernel: tpu_custom_call.1
= control target key start
LH: loop header
LB: loop body
LE: loop exit
PB: predicated region body
PF: predicated region fallthrough
CT: control target
= control target key end

     0   :  { %9 = vsyncpa [#allocation4], 0  ;;  %s1103_s0 = inlined_call_operand.hbm [shape: bf16[128,128], index: 0, kind: input, shape index: {}]   ;;  %s1104_s1 = inlined_call_operand.hbm [shape: bf16[128,128], index: 1, kind: input, shape index: {}]   ;;  %s1105_s2 = inlined_call_operand.vmem [shape: f32[1,128], index: 2, kind: input, shape index: {}]   ;;  %s1106_s3 = inlined_call_operand.hbm [shape: bf16[128,128], index: 3, kind: input, shape index: {}]   ;;  %s1107_s4 = inlined_call_operand.hbm [shape: bf16[128,128], index: 4, kind: output, shape index: {}]  }
   0x1   :  { %10 = vsyncpa [#allocation7], 0 }
   0x2   :  { %11 = vsyncpa [#allocation5], 0  ;;  %s1002_s15 = smov [#allocation6]   ;;  %s1003_s17 = smov [#allocation3]  }
   0x3   :  { %s29_s16 = sshll.u32 %s1002_s15, 4  ;;  %s17_s18 = sshll.u32 %s1003_s17, 4  ;;  %s30_s16 = int_to_ptr.vmem [resolvable:$true] %s29_s16  ;;  %s1033_s18 = int_to_ptr.vmem [resolvable:$true] %s17_s18 }
   0x4   :  { %s908_s21 = scalar_lea.hbm %s1104_s1, 1024 }
   0x5   :  { %p909_p0 = scmp.ne.s32.totalorder %s1104_s1, %s908_s21  ;;  %p912_p1 = scmp.lt.u32.totalorder %s908_s21, %s1104_s1 }
   0x7   :  { %p914_p2 = pnand %p912_p1, %p909_p0 }
   0x9   :  { %917 = shalt.err (!%p914_p2)
}
   0xa   :  { %s918_s26 = scalar_lea.vmem %s30_s16, 1024  ;;  %p923_p4 = scmp.lt.s32.totalorder %s30_s16, %s30_s16 }
   0xb   :  { %p919_p3 = scmp.ne.s32.totalorder %s30_s16, %s918_s26  ;;  %p924_p5 = scmp.lt.s32.totalorder %s918_s26, %s918_s26 }
   0xd   :  { %p925_p6 = por %p924_p5, %p923_p4 }
   0xf   :  { %p926_p7 = pnand %p925_p6, %p919_p3 }
  0x11   :  { %929 = shalt.err (!%p926_p7)
}
  0x12   :  { %s1004_s27 = smov 64   ;;  %s1005_s28 = smov 4  }
  0x13   :  { %35 = dma.hbm_to_vmem [thread:$0]  %s1104_s1, 1024, %s30_s16, [#allocation7], %s1004_s27, %s1004_s27, %s1005_s28  }
  0x14   :  { %s930_s7 = scalar_lea.hbm %s1103_s0, 1024 }
  0x15   :  { %p931_p8 = scmp.ne.s32.totalorder %s1103_s0, %s930_s7  ;;  %p934_p9 = scmp.lt.u32.totalorder %s930_s7, %s1103_s0 }
  0x17   :  { %p936_p10 = pnand %p934_p9, %p931_p8 }
  0x19   :  { %939 = shalt.err (!%p936_p10)
}
  0x1a   :  { %s940_s12 = scalar_lea.vmem %s1033_s18, 1024  ;;  %p945_p12 = scmp.lt.s32.totalorder %s1033_s18, %s1033_s18 }
  0x1b   :  { %p941_p11 = scmp.ne.s32.totalorder %s1033_s18, %s940_s12  ;;  %p946_p13 = scmp.lt.s32.totalorder %s940_s12, %s940_s12 }
  0x1d   :  { %p947_p0 = por %p946_p13, %p945_p12 }
  0x1f   :  { %p948_p1 = pnand %p947_p0, %p941_p11 }
  0x21   :  { %951 = shalt.err (!%p948_p1)
}
  0x22   :  { %23 = dma.hbm_to_vmem [thread:$0]  %s1103_s0, 1024, %s1033_s18, [#allocation4], %s1004_s27, %s1004_s27, %s1005_s28  }
  0x23   :  { %s1006_s14 = smov [#allocation8]   ;;  %s952_s19 = scalar_lea.hbm %s1106_s3, 1024 }
  0x24   :  { %s43_s15 = sshll.u32 %s1006_s14, 4  ;;  %p953_p2 = scmp.ne.s32.totalorder %s1106_s3, %s952_s19  ;;  %s44_s15 = int_to_ptr.vmem [resolvable:$true] %s43_s15 }
  0x25   :  { %p956_p3 = scmp.lt.u32.totalorder %s952_s19, %s1106_s3 }
  0x27   :  { %p958_p4 = pnand %p956_p3, %p953_p2 }
  0x29   :  { %961 = shalt.err (!%p958_p4)
}
  0x2a   :  { %s962_s24 = scalar_lea.vmem %s44_s15, 1024  ;;  %p967_p6 = scmp.lt.s32.totalorder %s44_s15, %s44_s15 }
  0x2b   :  { %p963_p5 = scmp.ne.s32.totalorder %s44_s15, %s962_s24  ;;  %p968_p7 = scmp.lt.s32.totalorder %s962_s24, %s962_s24 }
  0x2d   :  { %p969_p8 = por %p968_p7, %p967_p6 }
  0x2f   :  { %p970_p9 = pnand %p969_p8, %p963_p5 }
  0x31   :  { %973 = shalt.err (!%p970_p9)
}
  0x32   :  { %49 = dma.hbm_to_vmem [thread:$0]  %s1106_s3, 1024, %s44_s15, [#allocation7], %s1004_s27, %s1004_s27, %s1005_s28  }
  0x33   :  { %996 = dma.done.wait [#allocation4], 1024  }
  0x34   :  { %997 = vsyncadd [#allocation4], 4294966272 }
  0x35   :  { %998 = dma.done.wait [#allocation7], 2048  }
  0x36   :  { %999 = vsyncadd [#allocation7], 4294965248  ;;  %v884_v0 = vld [vmem:[#allocation6] sm:$0xff]   ;;  %v885_v1 = vld [vmem:[#allocation6 + $0x8] sm:$0xff]  }
  0x37   :  { %814 = vmatprep.subr.bf16.mxu0 %v884_v0  ;;  %v886_v2 = vld [vmem:[#allocation6 + $0x10] sm:$0xff]   ;;  %v887_v3 = vld [vmem:[#allocation6 + $0x18] sm:$0xff]   ;;  %v892_v4 = vld [vmem:[#allocation3] sm:$0xff]  }
  0x38   :  { %815 = vmatpush3.bf16.msra.mxu0 %v884_v0  ;;  %830 = vmatprep.mubr.bf16.mxu0 %v892_v4  ;;  %v888_v5 = vld [vmem:[#allocation6 + $0x20] sm:$0xff]   ;;  %v889_v6 = vld [vmem:[#allocation6 + $0x28] sm:$0xff]   ;;  %v890_v9 = vld [vmem:[#allocation6 + $0x30] sm:$0xff]  }
  0x39   :  { %816 = vmatprep.subr.bf16.mxu0 %v885_v1  ;;  %v900_v7 = vld [vmem:[#allocation8] sm:$0xff]   ;;  %v901_v8 = vld [vmem:[#allocation8 + $0x8] sm:$0xff]   ;;  %v902_v10 = vld [vmem:[#allocation8 + $0x10] sm:$0xff]  }
  0x3a   :  { %846 = vmatprep.subr.bf16.mxu1 %v900_v7  ;;  %v891_v11 = vld [vmem:[#allocation6 + $0x38] sm:$0xff]   ;;  %v904_v13 = vld [vmem:[#allocation8 + $0x20] sm:$0xff]   ;;  %v893_v14 = vld [vmem:[#allocation3 + $0x8] sm:$0xff]  }
  0x3b   :  { %847 = vmatpush3.bf16.msra.mxu1 %v900_v7  ;;  %v903_v12 = vld [vmem:[#allocation8 + $0x18] sm:$0xff]   ;;  %v894_v15 = vld [vmem:[#allocation3 + $0x10] sm:$0xff]   ;;  %v905_v16 = vld [vmem:[#allocation8 + $0x28] sm:$0xff]  }
  0x3c   :  { %817 = vmatpush3.bf16.msra.mxu0 %v885_v1  ;;  %848 = vmatprep.subr.bf16.mxu1 %v901_v8  ;;  %v895_v17 = vld [vmem:[#allocation3 + $0x18] sm:$0xff]   ;;  %v896_v18 = vld [vmem:[#allocation3 + $0x20] sm:$0xff]   ;;  %v897_v19 = vld [vmem:[#allocation3 + $0x28] sm:$0xff]  }
  0x3d   :  { %818 = vmatprep.subr.bf16.mxu0 %v886_v2  ;;  %v898_v20 = vld [vmem:[#allocation3 + $0x30] sm:$0xff]   ;;  %v899_v21 = vld [vmem:[#allocation3 + $0x38] sm:$0xff]   ;;  %v694_v24 = vld [vmem:[%s1105_s2] ss:$0 sm:$0xff]  ;;  %s1007_s2 = smov [#allocation9]  }
  0x3e   :  { %v906_v22 = vld [vmem:[#allocation8 + $0x30] sm:$0xff]   ;;  %v907_v23 = vld [vmem:[#allocation8 + $0x38] sm:$0xff]   ;;  %s665_s26 = sshll.u32 %s1007_s2, 4  ;;  %s666_s26 = int_to_ptr.vmem [resolvable:$true] %s665_s26 }
  0x3f   :  { %849 = vmatpush3.bf16.msra.mxu1 %v901_v8  ;;  %s974_s29 = scalar_lea.vmem %s666_s26, 1024  ;;  %p979_p11 = scmp.lt.s32.totalorder %s666_s26, %s666_s26 }
  0x40   :  { %819 = vmatpush3.bf16.msra.mxu0 %v886_v2  ;;  %850 = vmatprep.subr.bf16.mxu1 %v902_v10  ;;  %p975_p10 = scmp.ne.s32.totalorder %s666_s26, %s974_s29  ;;  %p980_p12 = scmp.lt.s32.totalorder %s974_s29, %s974_s29 }
  0x41   :  { %820 = vmatprep.subr.bf16.mxu0 %v887_v3 }
  0x42   :  { %p981_p13 = por %p980_p12, %p979_p11 }
  0x43   :  { %851 = vmatpush3.bf16.msra.mxu1 %v902_v10 }
  0x44   :  { %821 = vmatpush3.bf16.msra.mxu0 %v887_v3  ;;  %852 = vmatprep.subr.bf16.mxu1 %v903_v12  ;;  %p982_p0 = pnand %p981_p13, %p975_p10 }
  0x45   :  { %822 = vmatprep.subr.bf16.mxu0 %v888_v5 }
  0x47   :  { %853 = vmatpush3.bf16.msra.mxu1 %v903_v12 }
  0x48   :  { %823 = vmatpush3.bf16.msra.mxu0 %v888_v5  ;;  %854 = vmatprep.subr.bf16.mxu1 %v904_v13 }
  0x49   :  { %824 = vmatprep.subr.bf16.mxu0 %v889_v6 }
  0x4b   :  { %855 = vmatpush3.bf16.msra.mxu1 %v904_v13 }
  0x4c   :  { %825 = vmatpush3.bf16.msra.mxu0 %v889_v6  ;;  %856 = vmatprep.subr.bf16.mxu1 %v905_v16 }
  0x4d   :  { %826 = vmatprep.subr.bf16.mxu0 %v890_v9 }
  0x4f   :  { %857 = vmatpush3.bf16.msra.mxu1 %v905_v16 }
  0x50   :  { %827 = vmatpush3.bf16.msra.mxu0 %v890_v9  ;;  %858 = vmatprep.subr.bf16.mxu1 %v906_v22 }
  0x51   :  { %828 = vmatprep.subr.bf16.mxu0 %v891_v11 }
  0x53   :  { %859 = vmatpush3.bf16.msra.mxu1 %v906_v22 }
  0x54   :  { %829 = vmatpush3.bf16.msra.mxu0 %v891_v11  ;;  %860 = vmatprep.subr.bf16.mxu1 %v907_v23 }
  0x57   :  { %831 = vmatmul.mubr.bf16.vlgmr.msra.gmra.mrb[0].mxu0 %v893_v14  ;;  %861 = vmatpush3.bf16.msra.mxu1 %v907_v23 }
  0x58   :  { %834 = vmatprep.mubr.bf16.mxu0 %v894_v15 }
  0x5f   :  { %835 = vmatmul.mubr.bf16.gmra.mrb[4].mxu0 %v895_v17 }
  0x60   :  { %838 = vmatprep.mubr.bf16.mxu0 %v896_v18 }
  0x67   :  { %839 = vmatmul.mubr.bf16.gmra.mrb[8].mxu0 %v897_v19 }
  0x68   :  { %842 = vmatprep.mubr.bf16.mxu0 %v898_v20 }
  0x6f   :  { %843 = vmatmul.mubr.bf16.gmra.mrb[12].mxu0 %v899_v21 }
 0x12a   :  { %v832_v25 = vpop.f32.mrb[0].mxu0 }
 0x12b   :  { %v381_v26 = vadd.f32 %v832_v25, %v694_v24  ;;  %v258_v27 = vpop.f32.mrb[1].mxu0 }
 0x12c   :  { %v379_v28 = vadd.f32 %v694_v24, %v258_v27  ;;  %v833_v29 = vpop.f32.mrb[2].mxu0 }
 0x12d   :  { %v382_v30 = vadd.f32 %v833_v29, %v694_v24  ;;  %v261_v31 = vpop.f32.mrb[3].mxu0  ;;  %v397_v33 = vmax.f32 %v381_v26, 0.0 }
 0x12e   :  { %v380_v32 = vadd.f32 %v694_v24, %v261_v31  ;;  %v395_v35 = vmax.f32 %v379_v28, 0.0 }
 0x12f   :  { %v398_v34 = vmax.f32 %v382_v30, 0.0 }
 0x130   :  { %v396_v36 = vmax.f32 %v380_v32, 0.0 }
 0x131   :  { %v412_v37 = vpack.c.bf16 %v398_v34, %v397_v33 }
 0x132   :  { %v836_v38 = vpop.f32.mrb[4].mxu0  ;;  %v411_v39 = vpack.c.bf16 %v396_v36, %v395_v35 }
 0x133   :  { %v385_v40 = vadd.f32 %v836_v38, %v694_v24  ;;  %v274_v41 = vpop.f32.mrb[5].mxu0 }
 0x134   :  { %v383_v42 = vadd.f32 %v694_v24, %v274_v41  ;;  %v837_v43 = vpop.f32.mrb[6].mxu0  ;;  %862 = vmatprep.mubr.bf16.mxu1 %v411_v39 }
 0x135   :  { %v386_v44 = vadd.f32 %v837_v43, %v694_v24  ;;  %v277_v45 = vpop.f32.mrb[7].mxu0  ;;  %863 = vmatmul.mubr.bf16.vlgmr.msra.gmra.mrb[0].mxu1 %v412_v37  ;;  %v401_v47 = vmax.f32 %v385_v40, 0.0 }
 0x136   :  { %v384_v46 = vadd.f32 %v694_v24, %v277_v45  ;;  %v399_v49 = vmax.f32 %v383_v42, 0.0 }
 0x137   :  { %v402_v48 = vmax.f32 %v386_v44, 0.0 }
 0x138   :  { %v400_v50 = vmax.f32 %v384_v46, 0.0 }
 0x139   :  { %v414_v51 = vpack.c.bf16 %v402_v48, %v401_v47 }
 0x13a   :  { %v413_v52 = vpack.c.bf16 %v400_v50, %v399_v49  ;;  %v840_v53 = vpop.f32.mrb[8].mxu0 }
 0x13b   :  { %v389_v54 = vadd.f32 %v840_v53, %v694_v24  ;;  %v290_v55 = vpop.f32.mrb[9].mxu0 }
 0x13c   :  { %v387_v56 = vadd.f32 %v694_v24, %v290_v55  ;;  %v841_v57 = vpop.f32.mrb[10].mxu0  ;;  %866 = vmatprep.mubr.bf16.mxu1 %v413_v52 }
 0x13d   :  { %v390_v58 = vadd.f32 %v841_v57, %v694_v24  ;;  %v293_v59 = vpop.f32.mrb[11].mxu0  ;;  %867 = vmatmul.mubr.bf16.gmra.mrb[4].mxu1 %v414_v51  ;;  %v405_v61 = vmax.f32 %v389_v54, 0.0 }
 0x13e   :  { %v388_v60 = vadd.f32 %v694_v24, %v293_v59  ;;  %v403_v63 = vmax.f32 %v387_v56, 0.0 }
 0x13f   :  { %v406_v62 = vmax.f32 %v390_v58, 0.0 }
 0x140   :  { %v404_v0 = vmax.f32 %v388_v60, 0.0 }
 0x141   :  { %v416_v1 = vpack.c.bf16 %v406_v62, %v405_v61 }
 0x142   :  { %v415_v2 = vpack.c.bf16 %v404_v0, %v403_v63  ;;  %v844_v3 = vpop.f32.mrb[12].mxu0 }
 0x143   :  { %v393_v4 = vadd.f32 %v844_v3, %v694_v24  ;;  %v306_v5 = vpop.f32.mrb[13].mxu0 }
 0x144   :  { %v391_v6 = vadd.f32 %v694_v24, %v306_v5  ;;  %v845_v7 = vpop.f32.mrb[14].mxu0  ;;  %870 = vmatprep.mubr.bf16.mxu1 %v415_v2 }
 0x145   :  { %v394_v8 = vadd.f32 %v845_v7, %v694_v24  ;;  %v309_v9 = vpop.f32.mrb[15].mxu0  ;;  %871 = vmatmul.mubr.bf16.gmra.mrb[8].mxu1 %v416_v1  ;;  %v409_v11 = vmax.f32 %v393_v4, 0.0 }
 0x146   :  { %v392_v10 = vadd.f32 %v694_v24, %v309_v9  ;;  %v407_v13 = vmax.f32 %v391_v6, 0.0 }
 0x147   :  { %v410_v12 = vmax.f32 %v394_v8, 0.0 }
 0x148   :  { %v408_v14 = vmax.f32 %v392_v10, 0.0 }
 0x149   :  { %v418_v15 = vpack.c.bf16 %v410_v12, %v409_v11 }
 0x14a   :  { %v417_v16 = vpack.c.bf16 %v408_v14, %v407_v13 }
 0x14c   :  { %874 = vmatprep.mubr.bf16.mxu1 %v417_v16 }
 0x14d   :  { %875 = vmatmul.mubr.bf16.gmra.mrb[12].mxu1 %v418_v15 }
 0x208   :  { %v864_v17 = vpop.f32.mrb[0].mxu1 }
 0x209   :  { %v517_v18 = vpop.f32.mrb[1].mxu1 }
 0x20a   :  { %v865_v19 = vpop.f32.mrb[2].mxu1 }
 0x20b   :  { %v743_v20 = vpack.c.bf16 %v865_v19, %v864_v17  ;;  %v520_v21 = vpop.f32.mrb[3].mxu1 }
 0x20c   :  { %v738_v22 = vpack.c.bf16 %v520_v21, %v517_v18 }
 0x20d   :  { %775 = vst [vmem:[#allocation9 + $0x8] sm:$0xff] %v743_v20  }
 0x20e   :  { %739 = vst [vmem:[#allocation9] sm:$0xff] %v738_v22  }
 0x210   :  { %v868_v23 = vpop.f32.mrb[4].mxu1 }
 0x211   :  { %v533_v25 = vpop.f32.mrb[5].mxu1 }
 0x212   :  { %v869_v26 = vpop.f32.mrb[6].mxu1 }
 0x213   :  { %v753_v24 = vpack.c.bf16 %v869_v26, %v868_v23  ;;  %v536_v27 = vpop.f32.mrb[7].mxu1 }
 0x214   :  { %v748_v28 = vpack.c.bf16 %v536_v27, %v533_v25 }
 0x215   :  { %777 = vst [vmem:[#allocation9 + $0x18] sm:$0xff] %v753_v24  }
 0x216   :  { %776 = vst [vmem:[#allocation9 + $0x10] sm:$0xff] %v748_v28  }
 0x218   :  { %v872_v29 = vpop.f32.mrb[8].mxu1 }
 0x219   :  { %v549_v30 = vpop.f32.mrb[9].mxu1 }
 0x21a   :  { %v873_v31 = vpop.f32.mrb[10].mxu1 }
 0x21b   :  { %v763_v32 = vpack.c.bf16 %v873_v31, %v872_v29  ;;  %v552_v33 = vpop.f32.mrb[11].mxu1 }
 0x21c   :  { %v758_v34 = vpack.c.bf16 %v552_v33, %v549_v30 }
 0x21d   :  { %779 = vst [vmem:[#allocation9 + $0x28] sm:$0xff] %v763_v32  }
 0x21e   :  { %778 = vst [vmem:[#allocation9 + $0x20] sm:$0xff] %v758_v34  }
 0x220   :  { %v876_v35 = vpop.f32.mrb[12].mxu1 }
 0x221   :  { %v565_v36 = vpop.f32.mrb[13].mxu1 }
 0x222   :  { %v877_v37 = vpop.f32.mrb[14].mxu1 }
 0x223   :  { %v773_v38 = vpack.c.bf16 %v877_v37, %v876_v35  ;;  %v568_v39 = vpop.f32.mrb[15].mxu1 }
 0x224   :  { %v768_v40 = vpack.c.bf16 %v568_v39, %v565_v36 }
 0x225   :  { %781 = vst [vmem:[#allocation9 + $0x38] sm:$0xff] %v773_v38  }
 0x226   :  { %780 = vst [vmem:[#allocation9 + $0x30] sm:$0xff] %v768_v40  }
 0x227   :  { %985 = shalt.err (!%p982_p0)
}
 0x228   :  { %s986_s6 = scalar_lea.hbm %s1107_s4, 1024 }
 0x229   :  { %p987_p1 = scmp.ne.s32.totalorder %s1107_s4, %s986_s6  ;;  %p990_p2 = scmp.lt.u32.totalorder %s986_s6, %s1107_s4 }
 0x22b   :  { %p992_p3 = pnand %p990_p2, %p987_p1 }
 0x22d   :  { %995 = shalt.err (!%p992_p3)
}
 0x22e   :  { %671 = dma.vmem_to_hbm [thread:$0]  %s666_s26, 1024, %s1107_s4, [#allocation5], %s1004_s27, %s1004_s27, %s1005_s28  }
 0x22f   :  { %1000 = dma.done.wait [#allocation5], 1024  }
 0x230   :  { %1001 = vsyncadd [#allocation5], 4294966272 }
 0x231   :  { %675 = vsyncpa [#allocation4], 1 }
 0x232   :  { %676 = vsyncpa [#allocation7], 1 }
 0x233   :  { %677 = vsyncpa [#allocation5], 1 }

</bundles_post_ra>
